<compile_context>
chip_gen: v7x
topology: tpu7x:2x2x1
jax: 0.10.0
libtpu: 0.0.40
codegen_flags: <defaults>
</compile_context>

<pallas_src>
import jax
import jax.numpy as jnp
from jax.experimental import pallas as pl
from jax.experimental.pallas import tpu as pltpu

LANE = 128  # f32 vreg lane width — hidden dim padded to this; batch tiles are lane multiples


def policy_forward_kernel(xT_ref, w1t_ref, b1_ref, w2d_ref, b2d_ref, o_ref):
    """Fused linear1 + ReLU + linear2 + 2-class softmax, transposed (batch on lanes).

    xT_ref  : [n_states, tb]     activations, transposed (batch -> lanes)
    w1t_ref : [H_pad, n_states]  linear1 weight, transposed + hidden-padded
    b1_ref  : [H_pad, 1]         linear1 bias (column)
    w2d_ref : [1, H_pad]         w2[:, 0] - w2[:, 1] (row)
    b2d_ref : [1, 1]             b2[0] - b2[1]
    o_ref   : [2, tb]            probs^T (row 0 = P(action 0), row 1 = P(action 1))
    """
    # linear1 + ReLU: h^T [H_pad, tb] is lane-dense along the batch axis.
    hT = jnp.dot(w1t_ref[...], xT_ref[...], preferred_element_type=jnp.float32)
    hT = jnp.maximum(hT + b1_ref[...], 0.0)

    # 2-class softmax via the logit difference: d = l0 - l1, p0 = sigmoid(d), p1 = 1 - p0.
    d = jnp.dot(w2d_ref[...], hT, preferred_element_type=jnp.float32) + b2d_ref[...]
    p0 = 1.0 / (1.0 + jnp.exp(-d))          # [1, tb]; exact math, p0 + p1 == 1 by construction
    o_ref[0:1, :] = p0
    o_ref[1:2, :] = 1.0 - p0


def _cdiv(a, b):
    return -(-a // b)


def _choose_batch_tile(B, tile_b):
    """Pick (tb, n_tiles). Single full block for small batches; otherwise lane-multiple
    tiles with an even tile count (balances the parallel grid axis over v7x's 2 TCs)."""
    if B <= tile_b:
        return B, 1
    n = _cdiv(B, tile_b)
    if n % 2:
        n += 1
    tb = _cdiv(_cdiv(B, n), LANE) * LANE
    return tb, _cdiv(B, tb)


def prepare_policy_params(w1, b1, w2, b2):
    """One-time parameter prep for the kernel.

    Inputs stored [in, out] (transpose of torch's [out, in]):
      w1 [n_states, n_hidden], b1 [1, n_hidden], w2 [n_hidden, 2], b2 [1, 2].
    Returns (w1t [H_pad, n_states], b1c [H_pad, 1], w2d [1, H_pad], b2d [1, 1]) with the
    hidden dim zero-padded to a multiple of 128 (numerically inert)."""
    n_states, n_hidden = w1.shape
    assert w2.shape[1] == 2, "kernel is specialized to n_output == 2 (CartPole actions)"
    pad = (-n_hidden) % LANE
    if pad:
        w1 = jnp.pad(w1, ((0, 0), (0, pad)))
        b1 = jnp.pad(b1, ((0, 0), (0, pad)))
        w2 = jnp.pad(w2, ((0, pad), (0, 0)))
    w1t = w1.T                                    # [H_pad, n_states]
    b1c = b1.reshape(-1, 1)                       # [H_pad, 1]
    w2d = (w2[:, 0] - w2[:, 1]).reshape(1, -1)    # [1, H_pad]
    b2d = (b2[:, 0] - b2[:, 1]).reshape(1, 1)     # [1, 1]
    return w1t, b1c, w2d, b2d


def policy_forward(x, w1t, b1c, w2d, b2d, *, tile_b=4096):
    """x: [B, n_states] f32; params from prepare_policy_params. Returns probs [B, 2]."""
    B, n_states = x.shape
    tb, n_tiles = _choose_batch_tile(B, tile_b)

    xT = x.T  # [n_states, B]: batch -> lanes. Callers that already hold x^T can skip this.

    outT = pl.pallas_call(
        policy_forward_kernel,
        out_shape=jax.ShapeDtypeStruct((2, B), jnp.float32),
        grid=(n_tiles,),
        in_specs=[
            pl.BlockSpec((n_states, tb), lambda i: (0, i)),   # batch-tiled activations
            pl.BlockSpec(w1t.shape, lambda i: (0, 0)),        # weights: constant block index
            pl.BlockSpec(b1c.shape, lambda i: (0, 0)),        #   -> VMEM-resident, no
            pl.BlockSpec(w2d.shape, lambda i: (0, 0)),        #      per-step re-DMA
            pl.BlockSpec(b2d.shape, lambda i: (0, 0)),
        ],
        out_specs=pl.BlockSpec((2, tb), lambda i: (0, i)),    # lane-dense output tile
        compiler_params=pltpu.CompilerParams(
            dimension_semantics=("parallel",),                # megacore sharding on v7x
        ),
    )(xT, w1t, b1c, w2d, b2d)

    return outT.T  # [B, 2]


def init_policy_params(key, n_states, n_hidden, n_output):
    """nn.Linear-style init (uniform +/- 1/sqrt(fan_in)); stored [in, out]."""
    k1, k2, k3, k4 = jax.random.split(key, 4)
    lim1 = 1.0 / jnp.sqrt(jnp.float32(n_states))
    lim2 = 1.0 / jnp.sqrt(jnp.float32(n_hidden))
    w1 = jax.random.uniform(k1, (n_states, n_hidden), jnp.float32, -lim1, lim1)
    b1 = jax.random.uniform(k2, (1, n_hidden), jnp.float32, -lim1, lim1)
    w2 = jax.random.uniform(k3, (n_hidden, n_output), jnp.float32, -lim2, lim2)
    b2 = jax.random.uniform(k4, (1, n_output), jnp.float32, -lim2, lim2)
    return w1, b1, w2, b2


def _reference(x, w1, b1, w2, b2):
    h = jnp.maximum(x @ w1 + b1, 0.0)
    return jax.nn.softmax(h @ w2 + b2, axis=1)


if __name__ == "__main__":
    # CartPole-v0: n_states=4, 2 actions; hidden=32; small batch=2.
    B, n_states, n_hidden, n_output = 2, 4, 32, 2

    key = jax.random.PRNGKey(0)
    kx, kp, kbig = jax.random.split(key, 3)
    x = jax.random.normal(kx, (B, n_states), jnp.float32)
    w1, b1, w2, b2 = init_policy_params(kp, n_states, n_hidden, n_output)
    w1t, b1c, w2d, b2d = prepare_policy_params(w1, b1, w2, b2)

    # --- small-batch path (single full block) ---
    probs = jax.block_until_ready(policy_forward(x, w1t, b1c, w2d, b2d))
    ref = _reference(x, w1, b1, w2, b2)
    assert probs.shape == (B, n_output)
    assert jnp.allclose(probs, ref, atol=1e-5, rtol=1e-5)
    assert jnp.allclose(jnp.sum(probs, axis=1), 1.0, atol=1e-6)  # exact by construction

    # --- large-batch path (lane tiling, ragged final block, even parallel grid) ---
    B_big = 9000  # > tile_b and not a multiple of the chosen tile
    x_big = jax.random.normal(kbig, (B_big, n_states), jnp.float32)
    probs_big = jax.block_until_ready(policy_forward(x_big, w1t, b1c, w2d, b2d))
    ref_big = _reference(x_big, w1, b1, w2, b2)
    assert probs_big.shape == (B_big, n_output)
    assert jnp.allclose(probs_big, ref_big, atol=1e-5, rtol=1e-5)
    assert jnp.allclose(jnp.sum(probs_big, axis=1), 1.0, atol=1e-6)

    print("KERNEL_OK")
</pallas_src>

<mosaic_0001>
module attributes {stable_mosaic.version = 11 : i64} {
  func.func @policy_forward_kernel(%arg0: i32, %arg1: memref<4x2xf32, #tpu.memory_space<vmem>>, %arg2: memref<128x4xf32, #tpu.memory_space<vmem>>, %arg3: memref<128x1xf32, #tpu.memory_space<vmem>>, %arg4: memref<1x128xf32, #tpu.memory_space<vmem>>, %arg5: memref<1x1xf32, #tpu.memory_space<vmem>>, %arg6: memref<2x2xf32, #tpu.memory_space<vmem>>) attributes {dimension_semantics = [#tpu.dimension_semantics<parallel>], iteration_bounds = array<i64: 1>, scalar_prefetch = 0 : i64, scratch_operands = 0 : i64, tpu.core_type = #tpu.core_type<tc>, window_params = [{transform_indices = @transform_0, window_bounds = array<i64: 4, 2>}, {pipeline_mode = #tpu.pipeline_mode<synchronous>, transform_indices = @transform_1, window_bounds = array<i64: 128, 4>}, {pipeline_mode = #tpu.pipeline_mode<synchronous>, transform_indices = @transform_2, window_bounds = array<i64: 128, 1>}, {pipeline_mode = #tpu.pipeline_mode<synchronous>, transform_indices = @transform_3, window_bounds = array<i64: 1, 128>}, {pipeline_mode = #tpu.pipeline_mode<synchronous>, transform_indices = @transform_4, window_bounds = array<i64: 1, 1>}, {transform_indices = @transform_5, window_bounds = array<i64: 2, 2>}]} {
    %c0 = arith.constant 0 : index
    %c0_0 = arith.constant 0 : index
    %0 = vector.load %arg2[%c0, %c0_0] : memref<128x4xf32, #tpu.memory_space<vmem>>, vector<128x4xf32>
    %c0_1 = arith.constant 0 : index
    %c0_2 = arith.constant 0 : index
    %1 = vector.load %arg1[%c0_1, %c0_2] : memref<4x2xf32, #tpu.memory_space<vmem>>, vector<4x2xf32>
    %cst = arith.constant dense<0.000000e+00> : vector<128x2xf32>
    %2 = tpu.matmul %0, %1, %cst {dimension_numbers = #tpu.dot_dimension_numbers<[1], [0], [0], [1], [0, 0, 1, 1], [], []>} : vector<128x4xf32>, vector<4x2xf32>, vector<128x2xf32> -> vector<128x2xf32>
    %c0_3 = arith.constant 0 : index
    %c0_4 = arith.constant 0 : index
    %3 = vector.load %arg3[%c0_3, %c0_4] : memref<128x1xf32, #tpu.memory_space<vmem>>, vector<128x1xf32>
    %4 = vector.broadcast %3 : vector<128x1xf32> to vector<128x2xf32>
    %5 = arith.addf %2, %4 : vector<128x2xf32>
    %cst_5 = arith.constant 0.000000e+00 : f32
    %6 = vector.broadcast %cst_5 : f32 to vector<128x2xf32>
    %7 = arith.maximumf %5, %6 : vector<128x2xf32>
    %c0_6 = arith.constant 0 : index
    %c0_7 = arith.constant 0 : index
    %8 = vector.load %arg4[%c0_6, %c0_7] : memref<1x128xf32, #tpu.memory_space<vmem>>, vector<1x128xf32>
    %cst_8 = arith.constant dense<0.000000e+00> : vector<1x2xf32>
    %9 = tpu.matmul %8, %7, %cst_8 {dimension_numbers = #tpu.dot_dimension_numbers<[1], [0], [0], [1], [0, 0, 1, 1], [], []>} : vector<1x128xf32>, vector<128x2xf32>, vector<1x2xf32> -> vector<1x2xf32>
    %c0_9 = arith.constant 0 : index
    %c0_10 = arith.constant 0 : index
    %10 = vector.load %arg5[%c0_9, %c0_10] : memref<1x1xf32, #tpu.memory_space<vmem>>, vector<1x1xf32>
    %11 = vector.broadcast %10 : vector<1x1xf32> to vector<1x2xf32>
    %12 = arith.addf %9, %11 : vector<1x2xf32>
    %cst_11 = arith.constant 0.000000e+00 : f32
    %13 = vector.broadcast %cst_11 : f32 to vector<1x2xf32>
    %14 = arith.subf %13, %12 : vector<1x2xf32>
    %15 = math.exp %14 : vector<1x2xf32>
    %cst_12 = arith.constant 1.000000e+00 : f32
    %16 = vector.broadcast %cst_12 : f32 to vector<1x2xf32>
    %17 = arith.addf %16, %15 : vector<1x2xf32>
    %cst_13 = arith.constant 1.000000e+00 : f32
    %18 = vector.broadcast %cst_13 : f32 to vector<1x2xf32>
    %19 = arith.divf %18, %17 : vector<1x2xf32>
    %c0_14 = arith.constant 0 : index
    %c0_15 = arith.constant 0 : index
    %20 = vector.load %arg6[%c0_14, %c0_15] : memref<2x2xf32, #tpu.memory_space<vmem>>, vector<1x2xf32>
    tpu.vector_store %arg6[%c0_14, %c0_15], %19 {strides = array<i32>} : memref<2x2xf32, #tpu.memory_space<vmem>>, vector<1x2xf32>,
    %cst_16 = arith.constant 1.000000e+00 : f32
    %21 = vector.broadcast %cst_16 : f32 to vector<1x2xf32>
    %22 = arith.subf %21, %19 : vector<1x2xf32>
    %c1 = arith.constant 1 : index
    %c0_17 = arith.constant 0 : index
    %23 = vector.load %arg6[%c1, %c0_17] : memref<2x2xf32, #tpu.memory_space<vmem>>, vector<1x2xf32>
    tpu.vector_store %arg6[%c1, %c0_17], %22 {strides = array<i32>} : memref<2x2xf32, #tpu.memory_space<vmem>>, vector<1x2xf32>,
    return
  }
  func.func @transform_0(%arg0: i32) -> (i32, i32) {
    %c0_i32 = arith.constant 0 : i32
    %c0_i32_0 = arith.constant 0 : i32
    return %c0_i32, %arg0 : i32, i32
  }
  func.func @transform_1(%arg0: i32) -> (i32, i32) {
    %c0_i32 = arith.constant 0 : i32
    %c0_i32_0 = arith.constant 0 : i32
    %c0_i32_1 = arith.constant 0 : i32
    return %c0_i32, %c0_i32_0 : i32, i32
  }
  func.func @transform_2(%arg0: i32) -> (i32, i32) {
    %c0_i32 = arith.constant 0 : i32
    %c0_i32_0 = arith.constant 0 : i32
    %c0_i32_1 = arith.constant 0 : i32
    return %c0_i32, %c0_i32_0 : i32, i32
  }
  func.func @transform_3(%arg0: i32) -> (i32, i32) {
    %c0_i32 = arith.constant 0 : i32
    %c0_i32_0 = arith.constant 0 : i32
    %c0_i32_1 = arith.constant 0 : i32
    return %c0_i32, %c0_i32_0 : i32, i32
  }
  func.func @transform_4(%arg0: i32) -> (i32, i32) {
    %c0_i32 = arith.constant 0 : i32
    %c0_i32_0 = arith.constant 0 : i32
    %c0_i32_1 = arith.constant 0 : i32
    return %c0_i32, %c0_i32_0 : i32, i32
  }
  func.func @transform_5(%arg0: i32) -> (i32, i32) {
    %c0_i32 = arith.constant 0 : i32
    %c0_i32_0 = arith.constant 0 : i32
    return %c0_i32, %arg0 : i32, i32
  }
}

</mosaic_0001>

<bundles_post_ra>
// kernel: tpu_custom_call.1
= control target key start
LH: loop header
LB: loop body
LE: loop exit
PB: predicated region body
PF: predicated region fallthrough
CT: control target
= control target key end

     0   :  { %s802_s0 = inlined_call_operand.vmem [shape: f32[4,2], index: 0, kind: input, shape index: {}]   ;;  %s803_s1 = inlined_call_operand.vmem [shape: f32[128,4], index: 1, kind: input, shape index: {}]   ;;  %s804_s2 = inlined_call_operand.vmem [shape: f32[128,1], index: 2, kind: input, shape index: {}]   ;;  %s805_s3 = inlined_call_operand.vmem [shape: f32[1,128], index: 3, kind: input, shape index: {}]   ;;  %s806_s4 = inlined_call_operand.<no memory space> [shape: f32[1,1], index: 4, kind: input, shape index: {}]   ;;  %s807_s5 = inlined_call_operand.hbm [shape: f32[2,2], index: 5, kind: output, shape index: {}]  }
   0x1   :  { %v10_v0 = vstv %s806_s4 }
   0x2   :  { %11 = vst [vmem:[#allocation2] sm:$0x1] %v10_v0 }
   0x3   :  { %v39_v1 = vld [vmem:[%s802_s0] sm:$0xf]  ;;  %vm185_vm0 = vcmask 1043456   ;;  %vm136_vm1 = vcmask 31744   ;;  %v24_v3 = vld [vmem:[%s803_s1 + $0x8] sm:$0xff]  ;;  %v25_v4 = vld [vmem:[%s803_s1 + $0x10] sm:$0xff] }
   0x4   :  { %v23_v2 = vld [vmem:[%s803_s1] sm:$0xff]  ;;  %506 = vmatprep.subr.msk.mxu0 %vm185_vm0, %v39_v1  ;;  %v626_v5 = vmov 0   ;;  %v26_v6 = vld [vmem:[%s803_s1 + $0x18] sm:$0xff]  ;;  %v42_v9 = vld [vmem:[%s804_s2 + $0x10] sm:$0xff] }
   0x5   :  { %508 = vmatprep.mubr.msk.f32.mxu0 %vm136_vm1, %v23_v2  ;;  %507 = vmatpush3.msk.msra.mxu0 %vm185_vm0, %v39_v1  ;;  %v27_v7 = vld [vmem:[%s803_s1 + $0x20] sm:$0xff]  ;;  %v41_v10 = vld [vmem:[%s804_s2 + $0x8] sm:$0xff]  ;;  %v43_v12 = vld [vmem:[%s804_s2 + $0x18] sm:$0xff] }
   0x6   :  { %596 = vset.pattern.permute.xlu0 %v626_v5  ;;  %509 = vmatmul.mubr.msk.f32.vlgmr.msra.gmra.mrb[0].mxu0 %vm136_vm1, %v24_v3  ;;  %v40_v8 = vld [vmem:[%s804_s2] sm:$0xff]  ;;  %v28_v11 = vld [vmem:[%s803_s1 + $0x28] sm:$0xff]  ;;  %v29_v13 = vld [vmem:[%s803_s1 + $0x30] sm:$0xff] }
   0x7   :  { %597 = vset.pattern.permute.xlu1 %v626_v5  ;;  %511 = vmatprep.mubr.msk.f32.mxu0 %vm136_vm1, %v25_v4  ;;  %v44_v14 = vld [vmem:[%s804_s2 + $0x20] sm:$0xff] }
   0x8   :  { %58 = vperm.xlu0 %596, %v40_v8   ;;  %68 = vperm.xlu1 %597, %v42_v9  }
   0xa   :  { %512 = vmatmul.mubr.msk.f32.gmra.mrb[2].mxu0 %vm136_vm1, %v26_v6 }
   0xb   :  { %514 = vmatprep.mubr.msk.f32.mxu0 %vm136_vm1, %v27_v7 }
   0xc   :  { %63 = vperm.xlu0 %596, %v41_v10   ;;  %73 = vperm.xlu1 %597, %v43_v12  }
   0xe   :  { %515 = vmatmul.mubr.msk.f32.gmra.mrb[4].mxu0 %vm136_vm1, %v28_v11 }
   0xf   :  { %12 = vsyncpa [#allocation4], 0  ;;  %517 = vmatprep.mubr.msk.f32.mxu0 %vm136_vm1, %v29_v13  ;;  %v30_v15 = vld [vmem:[%s803_s1 + $0x38] sm:$0xff]  ;;  %v45_v16 = vld [vmem:[%s804_s2 + $0x28] sm:$0xff]  ;;  %v627_v36 = vmov 0.0|0.0   ;;  %vm628_vm2 = vmmov 0  }
  0x10   :  { %v31_v17 = vld [vmem:[%s803_s1 + $0x40] sm:$0xff]  ;;  %78 = vperm.xlu0 %596, %v44_v14   ;;  %v46_v18 = vld [vmem:[%s804_s2 + $0x30] sm:$0xff]  ;;  %83 = vperm.xlu1 %597, %v45_v16   ;;  %v32_v19 = vld [vmem:[%s803_s1 + $0x48] sm:$0xff]  ;;  %v629_v37 = vmov 0.0   ;;  %vm437_vm3 = vcmask 8192   ;;  %s630_s30 = smov [#allocation3]  }
  0x11   :  { %v47_v20 = vld [vmem:[%s804_s2 + $0x38] sm:$0xff]  ;;  %v33_v21 = vld [vmem:[%s803_s1 + $0x50] sm:$0xff]  ;;  %v48_v22 = vld [vmem:[%s804_s2 + $0x40] sm:$0xff]  ;;  %567 = vmatprep.subr.bf16.mxu1 %v627_v36  ;;  %564 = vmatprep.mubr.msk.f32.mxu1 %vm628_vm2, %v629_v37  ;;  %s447_s6 = sshll.u32 %s630_s30, 4  ;;  %s448_s6 = int_to_ptr.vmem [resolvable:$true] %s447_s6 }
  0x12   :  { %518 = vmatmul.mubr.msk.f32.gmra.mrb[6].mxu0 %vm136_vm1, %v30_v15  ;;  %v34_v23 = vld [vmem:[%s803_s1 + $0x58] sm:$0xff]  ;;  %v49_v24 = vld [vmem:[%s804_s2 + $0x48] sm:$0xff]  ;;  %v35_v25 = vld [vmem:[%s803_s1 + $0x60] sm:$0xff]  ;;  %p607_p1 = scmp.lt.s32.totalorder %s448_s6, %s448_s6 }
  0x13   :  { %520 = vmatprep.mubr.msk.f32.mxu0 %vm136_vm1, %v31_v17  ;;  %v50_v26 = vld [vmem:[%s804_s2 + $0x50] sm:$0xff]  ;;  %v36_v27 = vld [vmem:[%s803_s1 + $0x68] sm:$0xff]  ;;  %v51_v28 = vld [vmem:[%s804_s2 + $0x58] sm:$0xff] }
  0x14   :  { %88 = vperm.xlu0 %596, %v46_v18   ;;  %93 = vperm.xlu1 %597, %v47_v20   ;;  %v37_v29 = vld [vmem:[%s803_s1 + $0x70] sm:$0xff]  ;;  %v52_v30 = vld [vmem:[%s804_s2 + $0x60] sm:$0xff]  ;;  %v38_v31 = vld [vmem:[%s803_s1 + $0x78] sm:$0xff] }
  0x15   :  { %v53_v32 = vld [vmem:[%s804_s2 + $0x68] sm:$0xff]  ;;  %v54_v33 = vld [vmem:[%s804_s2 + $0x70] sm:$0xff]  ;;  %v55_v34 = vld [vmem:[%s804_s2 + $0x78] sm:$0xff] }
  0x16   :  { %521 = vmatmul.mubr.msk.f32.gmra.mrb[8].mxu0 %vm136_vm1, %v32_v19  ;;  %v351_v35 = vld [vmem:[#allocation2] sm:$0x1] }
  0x17   :  { %523 = vmatprep.mubr.msk.f32.mxu0 %vm136_vm1, %v33_v21 }
  0x18   :  { %98 = vperm.xlu0 %596, %v48_v22   ;;  %103 = vperm.xlu1 %597, %v49_v24  }
  0x1a   :  { %524 = vmatmul.mubr.msk.f32.gmra.mrb[10].mxu0 %vm136_vm1, %v34_v23 }
  0x1b   :  { %526 = vmatprep.mubr.msk.f32.mxu0 %vm136_vm1, %v35_v25 }
  0x1c   :  { %108 = vperm.xlu0 %596, %v50_v26   ;;  %113 = vperm.xlu1 %597, %v51_v28  }
  0x1e   :  { %527 = vmatmul.mubr.msk.f32.gmra.mrb[12].mxu0 %vm136_vm1, %v36_v27 }
  0x1f   :  { %529 = vmatprep.mubr.msk.f32.mxu0 %vm136_vm1, %v37_v29 }
  0x20   :  { %118 = vperm.xlu0 %596, %v52_v30   ;;  %123 = vperm.xlu1 %597, %v53_v32  }
  0x22   :  { %530 = vmatmul.mubr.msk.f32.gmra.mrb[14].mxu0 %vm136_vm1, %v38_v31 }
  0x24   :  { %128 = vperm.xlu0 %596, %v54_v33   ;;  %133 = vperm.xlu1 %597, %v55_v34  }
  0x28   :  { %354 = vperm.xlu0 %596, %v351_v35  }
  0x87   :  { %v69_v38 = vpop.permute.xlu1 %68  ;;  %v59_v39 = vpop.permute.xlu0 %58 }
  0x8b   :  { %v74_v40 = vpop.permute.xlu1 %73  ;;  %v64_v41 = vpop.permute.xlu0 %63 }
  0x8f   :  { %v84_v42 = vpop.permute.xlu1 %83  ;;  %v79_v43 = vpop.permute.xlu0 %78 }
  0x93   :  { %v94_v49 = vpop.permute.xlu1 %93  ;;  %v89_v52 = vpop.permute.xlu0 %88 }
  0x97   :  { %v104_v62 = vpop.permute.xlu1 %103  ;;  %v99_v1 = vpop.permute.xlu0 %98 }
  0x9b   :  { %v114_v10 = vpop.permute.xlu1 %113  ;;  %v109_v13 = vpop.permute.xlu0 %108 }
  0x9f   :  { %v124_v23 = vpop.permute.xlu1 %123  ;;  %v119_v26 = vpop.permute.xlu0 %118 }
  0xa3   :  { %v134_v35 = vpop.permute.xlu1 %133 }
  0xd9   :  { %v510_v44 = vpop.f32.mrb[0].mxu0 }
  0xda   :  { %v261_v45 = vadd.f32 %v510_v44, %v64_v41  ;;  %v255_v46 = vpop.f32.mrb[1].mxu0 }
  0xdb   :  { %v256_v47 = vadd.f32 %v255_v46, %v59_v39  ;;  %v129_v39 = vpop.permute.xlu0 %128 }
  0xdc   :  { %v335_v48 = vmax.f32 %v261_v45, 0.0 }
  0xdd   :  { %v334_v50 = vmax.f32 %v256_v47, 0.0  ;;  %v513_v51 = vpop.f32.mrb[2].mxu0  ;;  %v350_v47 = vld [vmem:[%s805_s3] sm:$0x1]  ;;  %s602_s3 = scalar_lea.vmem %s448_s6, 32 }
  0xde   :  { %v271_v53 = vadd.f32 %v513_v51, %v74_v40  ;;  %v265_v54 = vpop.f32.mrb[3].mxu0  ;;  %p603_p0 = scmp.ne.s32.totalorder %s448_s6, %s602_s3  ;;  %p608_p2 = scmp.lt.s32.totalorder %s602_s3, %s602_s3 }
  0xdf   :  { %v266_v55 = vadd.f32 %v265_v54, %v69_v38  ;;  %v568_v56 = vpack.c.bf16 %v335_v48, %v334_v50  ;;  %v357_v48 = vlaneseq  ;;  %v355_v51 = vpop.permute.xlu0 %354 }
  0xe0   :  { %v337_v57 = vmax.f32 %v271_v53, 0.0  ;;  %p609_p3 = por %p608_p2, %p607_p1 }
  0xe1   :  { %v336_v58 = vmax.f32 %v266_v55, 0.0  ;;  %v516_v59 = vpop.f32.mrb[4].mxu0  ;;  %569 = vmatpush3.bf16.msra.mxu1 %v568_v56 }
  0xe2   :  { %v281_v60 = vadd.f32 %v516_v59, %v84_v42  ;;  %v275_v61 = vpop.f32.mrb[5].mxu0  ;;  %570 = vmatprep.subr.bf16.mxu1 %v627_v36  ;;  %p610_p4 = pnand %p609_p3, %p603_p0 }
  0xe3   :  { %v571_v63 = vpack.c.bf16 %v337_v57, %v336_v58  ;;  %v276_v0 = vadd.f32 %v275_v61, %v79_v43 }
  0xe4   :  { %v339_v2 = vmax.f32 %v281_v60, 0.0 }
  0xe5   :  { %v338_v3 = vmax.f32 %v276_v0, 0.0  ;;  %v519_v4 = vpop.f32.mrb[6].mxu0  ;;  %572 = vmatpush3.bf16.msra.mxu1 %v571_v63 }
  0xe6   :  { %v291_v5 = vadd.f32 %v519_v4, %v94_v49  ;;  %v285_v6 = vpop.f32.mrb[7].mxu0  ;;  %573 = vmatprep.subr.bf16.mxu1 %v627_v36  ;;  %v358_v49 = vshrl.u32 %v357_v48, 7 }
  0xe7   :  { %v574_v7 = vpack.c.bf16 %v339_v2, %v338_v3  ;;  %v286_v8 = vadd.f32 %v285_v6, %v89_v52 }
  0xe8   :  { %v341_v9 = vmax.f32 %v291_v5, 0.0  ;;  %v359_v50 = vsub.s32 0, %v358_v49 }
  0xe9   :  { %v340_v11 = vmax.f32 %v286_v8, 0.0  ;;  %v522_v12 = vpop.f32.mrb[8].mxu0  ;;  %575 = vmatpush3.bf16.msra.mxu1 %v574_v7 }
  0xea   :  { %v301_v14 = vadd.f32 %v522_v12, %v104_v62  ;;  %v295_v15 = vpop.f32.mrb[9].mxu0  ;;  %576 = vmatprep.subr.bf16.mxu1 %v627_v36  ;;  %v360_v52 = vrot.slane %v355_v51, %v359_v50 }
  0xeb   :  { %v577_v16 = vpack.c.bf16 %v341_v9, %v340_v11  ;;  %v296_v17 = vadd.f32 %v295_v15, %v99_v1 }
  0xec   :  { %v343_v18 = vmax.f32 %v301_v14, 0.0 }
  0xed   :  { %v342_v19 = vmax.f32 %v296_v17, 0.0  ;;  %v525_v20 = vpop.f32.mrb[10].mxu0  ;;  %578 = vmatpush3.bf16.msra.mxu1 %v577_v16 }
  0xee   :  { %v311_v21 = vadd.f32 %v525_v20, %v114_v10  ;;  %v305_v22 = vpop.f32.mrb[11].mxu0  ;;  %579 = vmatprep.subr.bf16.mxu1 %v627_v36 }
  0xef   :  { %v580_v24 = vpack.c.bf16 %v343_v18, %v342_v19  ;;  %v306_v25 = vadd.f32 %v305_v22, %v109_v13 }
  0xf0   :  { %v345_v27 = vmax.f32 %v311_v21, 0.0 }
  0xf1   :  { %v344_v28 = vmax.f32 %v306_v25, 0.0  ;;  %v528_v29 = vpop.f32.mrb[12].mxu0  ;;  %581 = vmatpush3.bf16.msra.mxu1 %v580_v24 }
  0xf2   :  { %v321_v30 = vadd.f32 %v528_v29, %v124_v23  ;;  %v315_v31 = vpop.f32.mrb[13].mxu0  ;;  %582 = vmatprep.subr.bf16.mxu1 %v627_v36 }
  0xf3   :  { %v583_v32 = vpack.c.bf16 %v345_v27, %v344_v28  ;;  %v316_v33 = vadd.f32 %v315_v31, %v119_v26 }
  0xf4   :  { %v347_v34 = vmax.f32 %v321_v30, 0.0 }
  0xf5   :  { %v346_v37 = vmax.f32 %v316_v33, 0.0  ;;  %v531_v38 = vpop.f32.mrb[14].mxu0  ;;  %584 = vmatpush3.bf16.msra.mxu1 %v583_v32 }
  0xf6   :  { %v331_v40 = vadd.f32 %v531_v38, %v134_v35  ;;  %v325_v41 = vpop.f32.mrb[15].mxu0  ;;  %585 = vmatprep.subr.bf16.mxu1 %v627_v36 }
  0xf7   :  { %v586_v42 = vpack.c.bf16 %v347_v34, %v346_v37  ;;  %v326_v43 = vadd.f32 %v325_v41, %v129_v39 }
  0xf8   :  { %v349_v44 = vmax.f32 %v331_v40, 0.0 }
  0xf9   :  { %v348_v45 = vmax.f32 %v326_v43, 0.0  ;;  %587 = vmatpush3.bf16.msra.mxu1 %v586_v42 }
  0xfa   :  { %588 = vmatprep.subr.bf16.mxu1 %v627_v36 }
  0xfb   :  { %v589_v46 = vpack.c.bf16 %v349_v44, %v348_v45 }
  0xfd   :  { %590 = vmatpush3.bf16.msra.mxu1 %v589_v46 }
 0x100   :  { %565 = vmatmul.mubr.f32.vlgmr.msra.gmra.mrb[0].mxu1 %v350_v47 }
 0x1d3   :  { %v427_v53 = vpop.f32.mrb[0].mxu1 }
 0x1d4   :  { %v428_v54 = vadd.f32 %v427_v53, %v360_v52  ;;  %v566_v55 = vpop.f32.mrb[1].mxu1 }
 0x1d6   :  { %v431_v56 = vsub.f32 0.0, %v428_v54 }
 0x1d8   :  { %v432_v57 = vmul.f32 1.442695, %v431_v56 }
 0x1da   :  { %598 = vpow2.f32 %v432_v57 }
 0x1e4   :  { %v599_v58 = vpop.eup %598 }
 0x1e5   :  { %v434_v36 = vadd.f32 1.0, %v599_v58 }
 0x1e7   :  { %600 = vrcp.f32 %v434_v36 }
 0x1f1   :  { %v601_v59 = vpop.eup %600 }
 0x1f2   :  { %438 = vst.msk [vmem:[#allocation3] sm:$0x1] %vm437_vm3, %v601_v59  ;;  %v439_v60 = vsub.f32 1.0, %v601_v59 }
 0x1f4   :  { %440 = vst.msk [vmem:[#allocation3 + $0x1] sm:$0x1] %vm437_vm3, %v439_v60 }
 0x1f5   :  { %613 = shalt.err (!%p610_p4)
}
 0x1f6   :  { %s614_s9 = scalar_lea.hbm %s807_s5, 32 }
 0x1f7   :  { %p615_p5 = scmp.ne.s32.totalorder %s807_s5, %s614_s9  ;;  %p618_p6 = scmp.lt.u32.totalorder %s614_s9, %s807_s5 }
 0x1f9   :  { %p620_p7 = pnand %p618_p6, %p615_p5 }
 0x1fb   :  { %623 = shalt.err (!%p620_p7)
}
 0x1fc   :  { %450 = dma.vmem_to_hbm [thread:$0]  %s448_s6, 32, %s807_s5, [#allocation4]  }
 0x1fd   :  { %624 = dma.done.wait [#allocation4], 32  }
 0x1fe   :  { %625 = vsyncadd [#allocation4], 4294967264 }
 0x1ff   :  { %454 = vsyncpa [#allocation4], 1 }

</bundles_post_ra>
